<compile_context>
chip_gen: v6e
topology: v6e:2x2x1
jax: 0.10.0
libtpu: 0.0.40
codegen_flags: <defaults>
</compile_context>

<pallas_src>
import functools
import math

import numpy as np
import jax
import jax.numpy as jnp
from jax.experimental import pallas as pl
from jax.experimental.pallas import tpu as pltpu

_LANE = 128                         # vreg lane width: pad hidden/output feature dims to this
_VMEM_BUDGET = 48 * 1024 * 1024     # conservative resident budget (v7x has only 64 MiB / TC)


def _round_up(a, m):
    return ((a + m - 1) // m) * m


def _sublane_multiple(dtype):
    # packed sublane granularity: f32 -> 8 rows, bf16 -> 16, int8/fp8 -> 32
    return {4: 8, 2: 16, 1: 32}.get(np.dtype(dtype).itemsize, 8)


def _activation(name):
    """Mirrors get_activation(); elementwise fn, applied in f32 (VPU/EUP)."""
    if name is None:
        return lambda v: v
    if name == 'relu':
        return lambda v: jnp.maximum(v, 0.0)
    if name == 'lrelu':
        return lambda v: jnp.where(v >= 0, v, 0.01 * v)
    if name == 'sigmoid':
        return jax.nn.sigmoid
    if name == 'selu':
        return jax.nn.selu
    if name == 'elu':
        return jax.nn.elu
    if name == 'rrelu':
        # TODO(synk): RReLU samples a random slope per element in training; eval-mode mean slope used.
        slope = (1.0 / 8.0 + 1.0 / 3.0) / 2.0
        return lambda v: jnp.where(v >= 0, v, slope * v)
    raise NotImplementedError(name)


# --------------------------------------------------------------------------
# Pallas kernel: fused chain of (h @ W_l + b_l) -> activation_l
# --------------------------------------------------------------------------
def _mlp_kernel(*refs, num_layers, acts):
    # refs = x_ref, (w_ref, b_ref) * num_layers, out_ref
    x_ref = refs[0]
    out_ref = refs[-1]
    wb = refs[1:-1]

    h = x_ref[...]                                  # storage dtype (bf16 feeds MXU natively)
    for l in range(num_layers):                     # unrolled at trace time
        w = wb[2 * l][...]                          # (K_pad, M_pad), VMEM-resident
        b = wb[2 * l + 1][...]                      # (1,  M_pad),   VMEM-resident
        if h.dtype != w.dtype:
            h = h.astype(w.dtype)                   # match the weights' storage dtype for the MXU
        acc = jnp.dot(h, w, preferred_element_type=jnp.float32)   # f32 accumulation
        acc = acc + b.astype(jnp.float32)           # bias-add + activation in f32 (VPU/EUP)
        h = _activation(acts[l])(acc)
    out_ref[...] = h.astype(out_ref.dtype)          # one lane-dense store per row block


# --------------------------------------------------------------------------
# Wrapper
# --------------------------------------------------------------------------
def mlp_forward(x, weights, biases, *, activation='relu', last_activation='same',
                tile_n=None):
    """x: (N, in_features); weights[l]: (D_in_l, D_out_l) pre-transposed; biases[l]: (D_out_l,)."""
    if isinstance(x, tuple):                        # matches MLP.forward tuple handling
        x = x[0]

    n, d_in = x.shape
    num_layers = len(weights)
    assert num_layers > 0 and num_layers == len(biases)
    assert int(weights[0].shape[0]) == d_in
    d_out = int(weights[-1].shape[1])

    # Per-layer activations, matching MLP.__init__ (last_activation == 'same' -> activation).
    acts = tuple(
        last_activation if (j == num_layers - 1 and last_activation != 'same') else activation
        for j in range(num_layers)
    )

    # ---- lane-dense feature padding (hidden / output dims -> multiples of 128) -------------
    # Zero columns of W_l / b_l make the padded lanes carry activation(0); the matching zero
    # ROWS of W_{l+1} annihilate them, so real outputs are bit-exact. x itself stays unpadded
    # (its block uses the full d_in extent) to avoid an extra HBM copy of the input.
    # TODO(synk): on v6e/v7x, rounding the larger layers to 256 fills the 256-wide MXU better.
    padded_w, padded_b = [], []
    cur_in = d_in
    for w, b in zip(weights, biases):
        k, m = int(w.shape[0]), int(w.shape[1])
        m_p = _round_up(m, _LANE)
        wp = jnp.pad(w, ((0, cur_in - k), (0, m_p - m))) if (cur_in != k or m_p != m) else w
        b2 = b.reshape(1, -1)
        bp = jnp.pad(b2, ((0, 0), (0, m_p - m))) if m_p != m else b2
        padded_w.append(wp)
        padded_b.append(bp)
        cur_in = m_p
    d_out_p = cur_in

    x_item = np.dtype(x.dtype).itemsize
    sub = _sublane_multiple(x.dtype)

    # ---- VMEM-footprint-driven tile selection ----------------------------------------------
    resident = sum(int(np.prod(a.shape)) * np.dtype(a.dtype).itemsize
                   for a in padded_w + padded_b)
    # TODO(synk): if 2*resident exceeds the budget, tile the widest layer's K/N on its own
    # grid axis instead of keeping every layer fully VMEM-resident.
    max_h_p = max(int(w.shape[1]) for w in padded_w)
    per_row = (2 * d_in * x_item            # double-buffered x row block
               + 2 * d_out_p * x_item       # double-buffered output row block
               + 2 * max_h_p * 4)           # live f32 activations inside the body
    avail = max(_VMEM_BUDGET - 2 * resident, per_row * sub)

    if tile_n is None:
        tile_n = min(2048, avail // per_row)
    tile_n = max(sub, (int(tile_n) // sub) * sub)
    tile_n = min(tile_n, _round_up(n, sub))          # never bigger than the data
    # keep >=4 row blocks when there is enough work so both v7x TensorCores stay busy
    if n >= 4 * 256:
        tile_n = min(tile_n, max(256, _round_up(pl.cdiv(n, 4), sub)))

    grid = (pl.cdiv(n, tile_n),)                     # ragged last block handled by Pallas

    # ---- BlockSpecs -------------------------------------------------------------------------
    in_specs = [pl.BlockSpec((tile_n, d_in), lambda i: (i, 0))]
    flat_params = []
    for wp, bp in zip(padded_w, padded_b):
        in_specs.append(pl.BlockSpec(wp.shape, lambda i: (0, 0)))   # constant index -> fetched once
        in_specs.append(pl.BlockSpec(bp.shape, lambda i: (0, 0)))
        flat_params.extend([wp, bp])
    # TODO(synk): pipeline_mode=pl.Buffered(1) on the resident params (and Buffered(3) on x for
    # very narrow d_in) would shave reserved VMEM / hide DMA; left at defaults for portability.

    vmem_bytes = int(2 * resident + tile_n * per_row + (2 << 20))    # +2 MiB headroom
    vmem_bytes = min(100 * 1024 * 1024, max(vmem_bytes, 4 * 1024 * 1024))

    # Cost hint for XLA scheduling around the custom call.
    flops = 2 * n * sum(int(w.shape[0]) * int(w.shape[1]) for w in padded_w)
    transcendental_acts = {'sigmoid', 'selu', 'elu'}
    transcendentals = n * sum(int(w.shape[1]) for w, a in zip(padded_w, acts)
                              if a in transcendental_acts)
    bytes_accessed = n * d_in * x_item + n * d_out_p * x_item + resident

    kernel = functools.partial(_mlp_kernel, num_layers=num_layers, acts=acts)

    out = pl.pallas_call(
        kernel,
        out_shape=jax.ShapeDtypeStruct((n, d_out_p), x.dtype),
        grid=grid,
        in_specs=in_specs,
        out_specs=pl.BlockSpec((tile_n, d_out_p), lambda i: (i, 0)),
        compiler_params=pltpu.CompilerParams(
            dimension_semantics=("parallel",),       # shard row blocks across TCs (v7x)
            vmem_limit_bytes=vmem_bytes),
        cost_estimate=pl.CostEstimate(
            flops=flops,
            transcendentals=transcendentals,
            bytes_accessed=bytes_accessed),
    )(x, *flat_params)

    return out[:, :d_out] if d_out_p != d_out else out


# --------------------------------------------------------------------------
# Demo / correctness check
# --------------------------------------------------------------------------
if __name__ == "__main__":
    in_features = 32
    hid = (32, 32)
    batch = 2

    key = jax.random.PRNGKey(0)
    keys = jax.random.split(key, 2 * len(hid) + 1)

    dims = (in_features,) + tuple(hid)
    weights, biases = [], []
    for j in range(len(hid)):
        # nn.Linear default init: U(-1/sqrt(fan_in), 1/sqrt(fan_in)); stored pre-transposed (in, out).
        bound = 1.0 / math.sqrt(dims[j])
        w = jax.random.uniform(keys[2 * j], (dims[j], dims[j + 1]),
                               dtype=jnp.float32, minval=-bound, maxval=bound)
        b = jax.random.uniform(keys[2 * j + 1], (dims[j + 1],),
                               dtype=jnp.float32, minval=-bound, maxval=bound)
        weights.append(w)
        biases.append(b)

    x = jax.random.normal(keys[-1], (batch, in_features), dtype=jnp.float32)

    # f32 storage dtype path (matches PyTorch defaults).
    out = mlp_forward(x, weights, biases, activation='relu', last_activation='same')
    out = jax.block_until_ready(out)

    # Pure-numpy reference of Linear -> ReLU -> Linear -> ReLU.
    h = np.asarray(x)
    for w, b in zip(weights, biases):
        h = np.maximum(h @ np.asarray(w) + np.asarray(b), 0.0)
    np.testing.assert_allclose(np.asarray(out), h, rtol=1e-5, atol=1e-5)

    # bf16 storage dtype path: MXU consumes bf16 operands natively with f32 accumulation.
    out_bf16 = mlp_forward(x.astype(jnp.bfloat16),
                           [w.astype(jnp.bfloat16) for w in weights],
                           [b.astype(jnp.bfloat16) for b in biases],
                           activation='relu', last_activation='same')
    out_bf16 = jax.block_until_ready(out_bf16)
    np.testing.assert_allclose(np.asarray(out_bf16.astype(jnp.float32)), h, rtol=0.1, atol=0.1)

    print("KERNEL_OK")
</pallas_src>

<mosaic_0001>
module attributes {stable_mosaic.version = 11 : i64} {
  func.func @_mlp_kernel(%arg0: i32, %arg1: memref<8x32xf32, #tpu.memory_space<vmem>>, %arg2: memref<32x128xf32, #tpu.memory_space<vmem>>, %arg3: memref<1x128xf32, #tpu.memory_space<vmem>>, %arg4: memref<128x128xf32, #tpu.memory_space<vmem>>, %arg5: memref<1x128xf32, #tpu.memory_space<vmem>>, %arg6: memref<8x128xf32, #tpu.memory_space<vmem>>) attributes {dimension_semantics = [#tpu.dimension_semantics<parallel>], iteration_bounds = array<i64: 1>, scalar_prefetch = 0 : i64, scratch_operands = 0 : i64, tpu.core_type = #tpu.core_type<tc>, window_params = [{transform_indices = @transform_0, window_bounds = array<i64: 8, 32>}, {pipeline_mode = #tpu.pipeline_mode<synchronous>, transform_indices = @transform_1, window_bounds = array<i64: 32, 128>}, {pipeline_mode = #tpu.pipeline_mode<synchronous>, transform_indices = @transform_2, window_bounds = array<i64: 1, 128>}, {pipeline_mode = #tpu.pipeline_mode<synchronous>, transform_indices = @transform_3, window_bounds = array<i64: 128, 128>}, {pipeline_mode = #tpu.pipeline_mode<synchronous>, transform_indices = @transform_4, window_bounds = array<i64: 1, 128>}, {transform_indices = @transform_5, window_bounds = array<i64: 8, 128>}]} {
    %c0 = arith.constant 0 : index
    %c0_0 = arith.constant 0 : index
    %0 = vector.load %arg1[%c0, %c0_0] : memref<8x32xf32, #tpu.memory_space<vmem>>, vector<8x32xf32>
    %c0_1 = arith.constant 0 : index
    %c0_2 = arith.constant 0 : index
    %1 = vector.load %arg2[%c0_1, %c0_2] : memref<32x128xf32, #tpu.memory_space<vmem>>, vector<32x128xf32>
    %c0_3 = arith.constant 0 : index
    %c0_4 = arith.constant 0 : index
    %2 = vector.load %arg3[%c0_3, %c0_4] : memref<1x128xf32, #tpu.memory_space<vmem>>, vector<1x128xf32>
    %cst = arith.constant dense<0.000000e+00> : vector<8x128xf32>
    %3 = tpu.matmul %0, %1, %cst {dimension_numbers = #tpu.dot_dimension_numbers<[1], [0], [0], [1], [0, 0, 1, 1], [], []>} : vector<8x32xf32>, vector<32x128xf32>, vector<8x128xf32> -> vector<8x128xf32>
    %4 = vector.broadcast %2 : vector<1x128xf32> to vector<8x128xf32>
    %5 = arith.addf %3, %4 : vector<8x128xf32>
    %cst_5 = arith.constant 0.000000e+00 : f32
    %6 = vector.broadcast %cst_5 : f32 to vector<8x128xf32>
    %7 = arith.maximumf %5, %6 : vector<8x128xf32>
    %c0_6 = arith.constant 0 : index
    %c0_7 = arith.constant 0 : index
    %8 = vector.load %arg4[%c0_6, %c0_7] : memref<128x128xf32, #tpu.memory_space<vmem>>, vector<128x128xf32>
    %c0_8 = arith.constant 0 : index
    %c0_9 = arith.constant 0 : index
    %9 = vector.load %arg5[%c0_8, %c0_9] : memref<1x128xf32, #tpu.memory_space<vmem>>, vector<1x128xf32>
    %cst_10 = arith.constant dense<0.000000e+00> : vector<8x128xf32>
    %10 = tpu.matmul %7, %8, %cst_10 {dimension_numbers = #tpu.dot_dimension_numbers<[1], [0], [0], [1], [0, 0, 1, 1], [], []>} : vector<8x128xf32>, vector<128x128xf32>, vector<8x128xf32> -> vector<8x128xf32>
    %11 = vector.broadcast %9 : vector<1x128xf32> to vector<8x128xf32>
    %12 = arith.addf %10, %11 : vector<8x128xf32>
    %cst_11 = arith.constant 0.000000e+00 : f32
    %13 = vector.broadcast %cst_11 : f32 to vector<8x128xf32>
    %14 = arith.maximumf %12, %13 : vector<8x128xf32>
    %c0_12 = arith.constant 0 : index
    %c0_13 = arith.constant 0 : index
    %15 = vector.load %arg6[%c0_12, %c0_13] : memref<8x128xf32, #tpu.memory_space<vmem>>, vector<8x128xf32>
    tpu.vector_store %arg6[%c0_12, %c0_13], %14 {strides = array<i32>} : memref<8x128xf32, #tpu.memory_space<vmem>>, vector<8x128xf32>,
    return
  }
  func.func @transform_0(%arg0: i32) -> (i32, i32) {
    %c0_i32 = arith.constant 0 : i32
    %c0_i32_0 = arith.constant 0 : i32
    return %arg0, %c0_i32 : i32, i32
  }
  func.func @transform_1(%arg0: i32) -> (i32, i32) {
    %c0_i32 = arith.constant 0 : i32
    %c0_i32_0 = arith.constant 0 : i32
    %c0_i32_1 = arith.constant 0 : i32
    return %c0_i32, %c0_i32_0 : i32, i32
  }
  func.func @transform_2(%arg0: i32) -> (i32, i32) {
    %c0_i32 = arith.constant 0 : i32
    %c0_i32_0 = arith.constant 0 : i32
    %c0_i32_1 = arith.constant 0 : i32
    return %c0_i32, %c0_i32_0 : i32, i32
  }
  func.func @transform_3(%arg0: i32) -> (i32, i32) {
    %c0_i32 = arith.constant 0 : i32
    %c0_i32_0 = arith.constant 0 : i32
    %c0_i32_1 = arith.constant 0 : i32
    return %c0_i32, %c0_i32_0 : i32, i32
  }
  func.func @transform_4(%arg0: i32) -> (i32, i32) {
    %c0_i32 = arith.constant 0 : i32
    %c0_i32_0 = arith.constant 0 : i32
    %c0_i32_1 = arith.constant 0 : i32
    return %c0_i32, %c0_i32_0 : i32, i32
  }
  func.func @transform_5(%arg0: i32) -> (i32, i32) {
    %c0_i32 = arith.constant 0 : i32
    %c0_i32_0 = arith.constant 0 : i32
    return %arg0, %c0_i32 : i32, i32
  }
}

</mosaic_0001>

<bundles_post_ra>
// kernel: tpu_custom_call.1
= control target key start
LH: loop header
LB: loop body
LE: loop exit
PB: predicated region body
PF: predicated region fallthrough
CT: control target
= control target key end

     0   :  { %10 = vsyncpa [#allocation3], 0  ;;  %s521_s0 = inlined_call_operand.hbm [shape: f32[2,32], index: 0, kind: input, shape index: {}]   ;;  %s522_s1 = inlined_call_operand.hbm [shape: f32[32,128], index: 1, kind: input, shape index: {}]   ;;  %s523_s2 = inlined_call_operand.vmem [shape: f32[1,128], index: 2, kind: input, shape index: {}]   ;;  %s524_s3 = inlined_call_operand.hbm [shape: f32[128,128], index: 3, kind: input, shape index: {}]   ;;  %s525_s4 = inlined_call_operand.vmem [shape: f32[1,128], index: 4, kind: input, shape index: {}]   ;;  %s526_s5 = inlined_call_operand.hbm [shape: f32[2,128], index: 5, kind: output, shape index: {}]  }
   0x1   :  { %11 = vsyncpa [#allocation6], 0 }
   0x2   :  { %12 = vsyncpa [#allocation4], 0 }
   0x3   :  { %17 = vsyncadd [#allocation3], 96  ;;  %s429_s18 = smov [#allocation5]  }
   0x4   :  { %s30_s19 = sshll.u32 %s429_s18, 4  ;;  %s31_s19 = int_to_ptr.vmem [resolvable:$true] %s30_s19 }
   0x5   :  { %s351_s20 = scalar_lea.vmem %s31_s19, 512  ;;  %p356_p1 = scmp.lt.s32.totalorder %s31_s19, %s31_s19 }
   0x6   :  { %p352_p0 = scmp.ne.s32.totalorder %s31_s19, %s351_s20  ;;  %p357_p2 = scmp.lt.s32.totalorder %s351_s20, %s351_s20 }
   0x8   :  { %p358_p3 = por %p357_p2, %p356_p1 }
   0xa   :  { %p359_p4 = pnand %p358_p3, %p352_p0 }
   0xc   :  { %362 = shalt.err (!%p359_p4)
}
   0xd   :  { %s430_s21 = smov 128   ;;  %s431_s22 = smov 8  }
   0xe   :  { %36 = dma.hbm_to_vmem [thread:$0]  %s522_s1, 512, %s31_s19, [#allocation6], %s430_s21, %s430_s21, %s431_s22  }
   0xf   :  { %s432_s25 = smov [#allocation2]  }
  0x10   :  { %s18_s26 = sshll.u32 %s432_s25, 4  ;;  %s19_s26 = int_to_ptr.vmem [resolvable:$true] %s18_s26 }
  0x11   :  { %s371_s27 = scalar_lea.vmem %s19_s26, 32  ;;  %s375_s28 = scalar_lea.vmem %s19_s26, 128 }
  0x12   :  { %p372_p5 = scmp.ne.s32.totalorder %s19_s26, %s371_s27  ;;  %p376_p6 = scmp.lt.s32.totalorder %s19_s26, %s19_s26 }
  0x13   :  { %p377_p7 = scmp.lt.s32.totalorder %s375_s28, %s371_s27 }
  0x15   :  { %p378_p8 = por %p377_p7, %p376_p6 }
  0x17   :  { %p379_p9 = pnand %p378_p8, %p372_p5 }
  0x19   :  { %382 = shalt.err (!%p379_p9)
}
  0x1a   :  { %s433_s29 = smov 32   ;;  %s434_s30 = smov 2  }
  0x1b   :  { %24 = dma.hbm_to_vmem [thread:$0]  %s521_s0, 32, %s19_s26, [#allocation3], %s433_s29, %s433_s29, %s434_s30  }
  0x1c   :  { %s435_s1 = smov [#allocation7]  }
  0x1d   :  { %s44_s8 = sshll.u32 %s435_s1, 4  ;;  %s45_s8 = int_to_ptr.vmem [resolvable:$true] %s44_s8 }
  0x1e   :  { %s391_s9 = scalar_lea.vmem %s45_s8, 2048  ;;  %p396_p11 = scmp.lt.s32.totalorder %s45_s8, %s45_s8 }
  0x1f   :  { %p392_p10 = scmp.ne.s32.totalorder %s45_s8, %s391_s9  ;;  %p397_p12 = scmp.lt.s32.totalorder %s391_s9, %s391_s9 }
  0x21   :  { %p398_p13 = por %p397_p12, %p396_p11 }
  0x23   :  { %p399_p0 = pnand %p398_p13, %p392_p10 }
  0x25   :  { %402 = shalt.err (!%p399_p0)
}
  0x26   :  { %50 = dma.hbm_to_vmem [thread:$0]  %s524_s3, 2048, %s45_s8, [#allocation6], %s430_s21, %s430_s21, %s431_s22  }
  0x27   :  { %423 = dma.done.wait [#allocation3], 128  }
  0x28   :  { %424 = vsyncadd [#allocation3], 4294967168 }
  0x29   :  { %425 = dma.done.wait [#allocation6], 2560  }
  0x2a   :  { %426 = vsyncadd [#allocation6], 4294964736  ;;  %v436_v0 = vmov 0.0   ;;  %vm437_vm0 = vmmov 0   ;;  %v66_v1 = vld [vmem:[#allocation5 + $0x18] sm:$0xff]  ;;  %v65_v2 = vld [vmem:[#allocation5 + $0x10] sm:$0xff] }
  0x2b   :  { %287 = vmatprep.subr.mxu0 %v436_v0  ;;  %295 = vmatprep.mubr.msk.f32.mxu0 %vm437_vm0, %v436_v0  ;;  %v164_v3 = vld [vmem:[#allocation7 + $0x78] sm:$0xff]  ;;  %v64_v4 = vld [vmem:[#allocation5 + $0x8] sm:$0xff]  ;;  %v163_v5 = vld [vmem:[#allocation7 + $0x70] sm:$0xff]  ;;  %vm74_vm1 = vcmask 261120  }
  0x2c   :  { %298 = vmatprep.subr.mxu1 %v436_v0  ;;  %330 = vmatprep.mubr.msk.f32.mxu1 %vm437_vm0, %v436_v0  ;;  %v162_v6 = vld [vmem:[#allocation7 + $0x68] sm:$0xff]  ;;  %v63_v7 = vld [vmem:[#allocation5] sm:$0xff]  ;;  %v62_v8 = vld [vmem:[#allocation2] sm:$0xff] }
  0x2d   :  { %288 = vmatpush3.msra.mxu0 %v66_v1  ;;  %299 = vmatpush3.msra.mxu1 %v164_v3  ;;  %v161_v9 = vld [vmem:[#allocation7 + $0x60] sm:$0xff]  ;;  %v160_v10 = vld [vmem:[#allocation7 + $0x58] sm:$0xff]  ;;  %v159_v11 = vld [vmem:[#allocation7 + $0x50] sm:$0xff] }
  0x2e   :  { %289 = vmatprep.subr.mxu0 %v436_v0  ;;  %300 = vmatprep.subr.mxu1 %v436_v0  ;;  %v158_v12 = vld [vmem:[#allocation7 + $0x48] sm:$0xff]  ;;  %v157_v13 = vld [vmem:[#allocation7 + $0x40] sm:$0xff]  ;;  %v156_v14 = vld [vmem:[#allocation7 + $0x38] sm:$0xff] }
  0x2f   :  { %290 = vmatpush3.msra.mxu0 %v65_v2  ;;  %301 = vmatpush3.msra.mxu1 %v163_v5  ;;  %v155_v15 = vld [vmem:[#allocation7 + $0x30] sm:$0xff]  ;;  %v154_v16 = vld [vmem:[#allocation7 + $0x28] sm:$0xff]  ;;  %v153_v17 = vld [vmem:[#allocation7 + $0x20] sm:$0xff] }
  0x30   :  { %291 = vmatprep.subr.mxu0 %v436_v0  ;;  %302 = vmatprep.subr.mxu1 %v436_v0  ;;  %v152_v18 = vld [vmem:[#allocation7 + $0x18] sm:$0xff]  ;;  %v151_v19 = vld [vmem:[#allocation7 + $0x10] sm:$0xff]  ;;  %v150_v20 = vld [vmem:[#allocation7 + $0x8] sm:$0xff] }
  0x31   :  { %292 = vmatpush3.msra.mxu0 %v64_v4  ;;  %303 = vmatpush3.msra.mxu1 %v162_v6  ;;  %v149_v21 = vld [vmem:[#allocation7] sm:$0xff]  ;;  %v262_v22 = vld [vmem:[%s523_s2] ss:$0 sm:$0xff] }
  0x32   :  { %293 = vmatprep.subr.mxu0 %v436_v0  ;;  %304 = vmatprep.subr.mxu1 %v436_v0  ;;  %v264_v27 = vld [vmem:[%s525_s4] ss:$0 sm:$0xff] }
  0x33   :  { %294 = vmatpush3.msra.mxu0 %v63_v7  ;;  %305 = vmatpush3.msra.mxu1 %v161_v9 }
  0x34   :  { %296 = vmatmul.mubr.msk.f32.vlgmr.msra.gmra.mxu0 %vm74_vm1, %v62_v8  ;;  %306 = vmatprep.subr.mxu1 %v436_v0 }
  0x35   :  { %307 = vmatpush3.msra.mxu1 %v160_v10 }
  0x36   :  { %308 = vmatprep.subr.mxu1 %v436_v0 }
  0x37   :  { %309 = vmatpush3.msra.mxu1 %v159_v11 }
  0x38   :  { %310 = vmatprep.subr.mxu1 %v436_v0 }
  0x39   :  { %311 = vmatpush3.msra.mxu1 %v158_v12 }
  0x3a   :  { %312 = vmatprep.subr.mxu1 %v436_v0 }
  0x3b   :  { %313 = vmatpush3.msra.mxu1 %v157_v13 }
  0x3c   :  { %314 = vmatprep.subr.mxu1 %v436_v0 }
  0x3d   :  { %315 = vmatpush3.msra.mxu1 %v156_v14 }
  0x3e   :  { %316 = vmatprep.subr.mxu1 %v436_v0 }
  0x3f   :  { %317 = vmatpush3.msra.mxu1 %v155_v15 }
  0x40   :  { %318 = vmatprep.subr.mxu1 %v436_v0 }
  0x41   :  { %319 = vmatpush3.msra.mxu1 %v154_v16 }
  0x42   :  { %320 = vmatprep.subr.mxu1 %v436_v0 }
  0x43   :  { %321 = vmatpush3.msra.mxu1 %v153_v17 }
  0x44   :  { %322 = vmatprep.subr.mxu1 %v436_v0 }
  0x45   :  { %323 = vmatpush3.msra.mxu1 %v152_v18 }
  0x46   :  { %324 = vmatprep.subr.mxu1 %v436_v0 }
  0x47   :  { %325 = vmatpush3.msra.mxu1 %v151_v19 }
  0x48   :  { %326 = vmatprep.subr.mxu1 %v436_v0 }
  0x49   :  { %327 = vmatpush3.msra.mxu1 %v150_v20 }
  0x4a   :  { %328 = vmatprep.subr.mxu1 %v436_v0 }
  0x4b   :  { %329 = vmatpush3.msra.mxu1 %v149_v21 }
  0xf4   :  { %v144_v23 = vpop.f32.mrf.mxu0 }
  0xf5   :  { %v145_v24 = vadd.f32 %v262_v22, %v144_v23 }
  0xf6   :  { %v297_v25 = vpop.f32.mrf.mxu0 }
  0xf7   :  { %v148_v26 = vmax.f32 %v145_v24, 0.0 }
  0xf9   :  { %331 = vmatmul.mubr.f32.vlgmr.msra.gmra.mxu1 %v148_v26 }
 0x1b9   :  { %v238_v28 = vpop.f32.mrf.mxu1 }
 0x1ba   :  { %v239_v29 = vadd.f32 %v264_v27, %v238_v28 }
 0x1bb   :  { %v332_v30 = vpop.f32.mrf.mxu1 }
 0x1bc   :  { %v242_v31 = vmax.f32 %v239_v29, 0.0 }
 0x1be   :  { %243 = vst [vmem:[#allocation8] sm:$0xff] %v242_v31 }
 0x1bf   :  { %248 = vsyncadd [#allocation4], 96  ;;  %s438_s14 = smov [#allocation8]  }
 0x1c0   :  { %s249_s15 = sshll.u32 %s438_s14, 4  ;;  %s250_s15 = int_to_ptr.vmem [resolvable:$true] %s249_s15 }
 0x1c1   :  { %s403_s16 = scalar_lea.vmem %s250_s15, 32  ;;  %s407_s2 = scalar_lea.vmem %s250_s15, 128 }
 0x1c2   :  { %p404_p1 = scmp.ne.s32.totalorder %s250_s15, %s403_s16  ;;  %p408_p2 = scmp.lt.s32.totalorder %s250_s15, %s250_s15 }
 0x1c3   :  { %p409_p3 = scmp.lt.s32.totalorder %s407_s2, %s403_s16 }
 0x1c5   :  { %p410_p4 = por %p409_p3, %p408_p2 }
 0x1c7   :  { %p411_p5 = pnand %p410_p4, %p404_p1 }
 0x1c9   :  { %414 = shalt.err (!%p411_p5)
}
 0x1ca   :  { %255 = dma.vmem_to_hbm [thread:$0]  %s250_s15, 32, %s526_s5, [#allocation4], %s433_s29, %s433_s29, %s434_s30  }
 0x1cb   :  { %427 = dma.done.wait [#allocation4], 128  }
 0x1cc   :  { %428 = vsyncadd [#allocation4], 4294967168 }
 0x1cd   :  { %259 = vsyncpa [#allocation3], 1 }
 0x1ce   :  { %260 = vsyncpa [#allocation6], 1 }
 0x1cf   :  { %261 = vsyncpa [#allocation4], 1 }

</bundles_post_ra>
